<compile_context>
chip_gen: v7x
topology: tpu7x:2x2x1
jax: 0.10.0
libtpu: 0.0.40
codegen_flags: <defaults>
</compile_context>

<pallas_src>
import math

import jax
import jax.numpy as jnp
from jax.experimental import pallas as pl
from jax.experimental.pallas import tpu as pltpu


def inverse_softplus(x: float) -> float:
    return math.log(math.exp(x) - 1.0)


def _round_up(x: int, m: int) -> int:
    return (x + m - 1) // m * m


# ---------------------------------------------------------------------------
# Kernels
# ---------------------------------------------------------------------------

def _mc_kernel(x_ref, wm_ref, wr_ref, wn_ref, bm_ref, br_ref, bn_ref,
               o_ref, acc_ref):
    """MC tile: y = x @ (wm + softplus(wr)*wn).T + (bm + softplus(br)*bn)."""
    k = pl.program_id(2)

    @pl.when(k == 0)
    def _():
        acc_ref[...] = jnp.zeros_like(acc_ref)

    # Perturbed weight tile [tn, tk] in its natural layout (no transpose).
    w = wm_ref[...] + jax.nn.softplus(wr_ref[...]) * wn_ref[...]

    # x [tm, tk] . w [tn, tk], contracting the in_features axis of both
    # (equivalent to x @ w.T without an XLU transpose of the weight tile).
    acc_ref[...] += jax.lax.dot_general(
        x_ref[...], w,
        dimension_numbers=(((1,), (1,)), ((), ())),
        preferred_element_type=jnp.float32)

    @pl.when(k == pl.num_programs(2) - 1)
    def _():
        # Perturbed bias computed once, only at the final reduction step.
        b = bm_ref[...] + jax.nn.softplus(br_ref[...]) * bn_ref[...]
        o_ref[...] = (acc_ref[...] + b).astype(o_ref.dtype)


def _map_kernel(x_ref, wm_ref, bm_ref, o_ref, acc_ref):
    """MAP tile: y = x @ w_mean.T + b_mean (no rho / noise streams at all)."""
    k = pl.program_id(2)

    @pl.when(k == 0)
    def _():
        acc_ref[...] = jnp.zeros_like(acc_ref)

    acc_ref[...] += jax.lax.dot_general(
        x_ref[...], wm_ref[...],
        dimension_numbers=(((1,), (1,)), ((), ())),
        preferred_element_type=jnp.float32)

    @pl.when(k == pl.num_programs(2) - 1)
    def _():
        o_ref[...] = (acc_ref[...] + bm_ref[...]).astype(o_ref.dtype)


# ---------------------------------------------------------------------------
# Wrapper
# ---------------------------------------------------------------------------

def bayesian_linear_forward(x, w_mean, w_rho, b_mean, b_rho, *, mode, key=None,
                            tm=128, tn=256, tk=512):
    """Pallas implementation of BayesianLinear.forward.

    x:      [B, in_features]   float32
    w_mean: [out, in]          float32
    w_rho:  [out, in]          float32
    b_mean: [out]              float32
    b_rho:  [out]              float32
    returns [B, out]           float32
    """
    B, in_f = x.shape
    out_f, in_f2 = w_mean.shape
    assert in_f == in_f2

    # Clamp tiles to the (padded) problem size; keep sublane/lane alignment.
    tm = min(tm, _round_up(B, 8))        # sublane-aligned batch tile
    tn = min(tn, _round_up(out_f, 128))  # lane-dense output tile
    tk = min(tk, _round_up(in_f, 128))   # lane-dense reduction tile
    Mp = _round_up(B, tm)
    Np = _round_up(out_f, tn)
    Kp = _round_up(in_f, tk)

    def pad2(a, rows, cols):
        return jnp.pad(a, ((0, rows - a.shape[0]), (0, cols - a.shape[1])))

    xp = pad2(x, Mp, Kp)
    wmp = pad2(w_mean, Np, Kp)
    bmp = jnp.pad(b_mean, (0, Np - out_f)).reshape(1, Np)

    grid = (Mp // tm, Np // tn, Kp // tk)
    x_spec = pl.BlockSpec((tm, tk), lambda i, j, k: (i, k))
    w_spec = pl.BlockSpec((tn, tk), lambda i, j, k: (j, k))
    b_spec = pl.BlockSpec((1, tn), lambda i, j, k: (0, j))
    o_spec = pl.BlockSpec((tm, tn), lambda i, j, k: (i, j))

    cparams = pltpu.CompilerParams(
        dimension_semantics=("parallel", "parallel", "arbitrary"),
        vmem_limit_bytes=32 * 1024 * 1024)

    if mode == 'MAP':
        out = pl.pallas_call(
            _map_kernel,
            out_shape=jax.ShapeDtypeStruct((Mp, Np), x.dtype),
            grid_spec=pltpu.PrefetchScalarGridSpec(
                num_scalar_prefetch=0,
                grid=grid,
                in_specs=[x_spec, w_spec, b_spec],
                out_specs=o_spec,
                scratch_shapes=[pltpu.VMEM((tm, tn), jnp.float32)]),
            compiler_params=cparams,
        )(xp, wmp, bmp)
    elif mode == 'MC':
        assert key is not None
        kw, kb = jax.random.split(key)
        w_noise = jax.random.normal(kw, w_mean.shape, dtype=w_mean.dtype)
        b_noise = jax.random.normal(kb, b_mean.shape, dtype=b_mean.dtype)

        # Zero-pad mean AND noise, so padded rows/cols of the perturbed weight
        # are exactly zero: 0 + softplus(rho_pad) * 0 == 0.
        wrp = pad2(w_rho, Np, Kp)
        wnp = pad2(w_noise, Np, Kp)
        brp = jnp.pad(b_rho, (0, Np - out_f)).reshape(1, Np)
        bnp = jnp.pad(b_noise, (0, Np - out_f)).reshape(1, Np)

        out = pl.pallas_call(
            _mc_kernel,
            out_shape=jax.ShapeDtypeStruct((Mp, Np), x.dtype),
            grid_spec=pltpu.PrefetchScalarGridSpec(
                num_scalar_prefetch=0,
                grid=grid,
                in_specs=[x_spec, w_spec, w_spec, w_spec,
                          b_spec, b_spec, b_spec],
                out_specs=o_spec,
                scratch_shapes=[pltpu.VMEM((tm, tn), jnp.float32)]),
            compiler_params=cparams,
        )(xp, wmp, wrp, wnp, bmp, brp, bnp)
    else:
        raise ValueError(mode)

    return out[:B, :out_f]


if __name__ == "__main__":
    # Small shapes consistent with a Linear layer.
    batch, in_features, out_features = 8, 32, 32
    prior_stddev = 0.1

    key = jax.random.PRNGKey(0)
    k_x, k_w, k_b, k_noise = jax.random.split(key, 4)

    # Deterministic synthetic parameters (posterior mean ~ nn.Linear-style init).
    bound = 1.0 / math.sqrt(in_features)
    w_mean = jax.random.uniform(k_w, (out_features, in_features),
                                minval=-bound, maxval=bound, dtype=jnp.float32)
    b_mean = jax.random.uniform(k_b, (out_features,),
                                minval=-bound, maxval=bound, dtype=jnp.float32)
    # rho initialized to inverse_softplus(prior_stddev), as in BayesianLayer.__init__.
    rho0 = inverse_softplus(prior_stddev)
    w_rho = jnp.full((out_features, in_features), rho0, dtype=jnp.float32)
    b_rho = jnp.full((out_features,), rho0, dtype=jnp.float32)

    x = jax.random.normal(k_x, (batch, in_features), dtype=jnp.float32)

    # --- MC mode (stochastic forward with deterministic noise key) ---
    y_mc = bayesian_linear_forward(x, w_mean, w_rho, b_mean, b_rho,
                                   mode='MC', key=k_noise)
    jax.block_until_ready(y_mc)

    # --- MAP mode (posterior-mean linear, specialized kernel) ---
    y_map = bayesian_linear_forward(x, w_mean, w_rho, b_mean, b_rho, mode='MAP')
    jax.block_until_ready(y_map)

    # Reference checks in plain JAX (same noise key split as the wrapper).
    kw, kb = jax.random.split(k_noise)
    eps_w = jax.random.normal(kw, w_mean.shape, dtype=jnp.float32)
    eps_b = jax.random.normal(kb, b_mean.shape, dtype=jnp.float32)
    w_pert = w_mean + jax.nn.softplus(w_rho) * eps_w
    b_pert = b_mean + jax.nn.softplus(b_rho) * eps_b
    ref_mc = x @ w_pert.T + b_pert
    ref_map = x @ w_mean.T + b_mean

    assert y_mc.shape == ref_mc.shape and y_map.shape == ref_map.shape
    assert jnp.allclose(y_mc, ref_mc, atol=1e-5, rtol=1e-5), "MC mismatch"
    assert jnp.allclose(y_map, ref_map, atol=1e-5, rtol=1e-5), "MAP mismatch"

    print("KERNEL_OK")
</pallas_src>

<mosaic_0001>
module attributes {stable_mosaic.version = 11 : i64} {
  func.func @_mc_kernel(%arg0: i32, %arg1: i32, %arg2: i32, %arg3: memref<8x128xf32, #tpu.memory_space<vmem>>, %arg4: memref<128x128xf32, #tpu.memory_space<vmem>>, %arg5: memref<128x128xf32, #tpu.memory_space<vmem>>, %arg6: memref<128x128xf32, #tpu.memory_space<vmem>>, %arg7: memref<1x128xf32, #tpu.memory_space<vmem>>, %arg8: memref<1x128xf32, #tpu.memory_space<vmem>>, %arg9: memref<1x128xf32, #tpu.memory_space<vmem>>, %arg10: memref<8x128xf32, #tpu.memory_space<vmem>>, %arg11: memref<8x128xf32, #tpu.memory_space<vmem>>) attributes {dimension_semantics = [#tpu.dimension_semantics<parallel>, #tpu.dimension_semantics<parallel>, #tpu.dimension_semantics<arbitrary>], iteration_bounds = array<i64: 1, 1, 1>, scalar_prefetch = 0 : i64, scratch_operands = 1 : i64, tpu.core_type = #tpu.core_type<tc>, window_params = [{transform_indices = @transform_0, window_bounds = array<i64: 8, 128>}, {transform_indices = @transform_1, window_bounds = array<i64: 128, 128>}, {transform_indices = @transform_2, window_bounds = array<i64: 128, 128>}, {transform_indices = @transform_3, window_bounds = array<i64: 128, 128>}, {transform_indices = @transform_4, window_bounds = array<i64: 1, 128>}, {transform_indices = @transform_5, window_bounds = array<i64: 1, 128>}, {transform_indices = @transform_6, window_bounds = array<i64: 1, 128>}, {transform_indices = @transform_7, window_bounds = array<i64: 8, 128>}]} {
    %c0_i32 = arith.constant 0 : i32
    %0 = arith.cmpi eq, %arg2, %c0_i32 : i32
    %1 = arith.extui %0 : i1 to i32
    %c0_i32_0 = arith.constant 0 : i32
    %2 = arith.cmpi ne, %1, %c0_i32_0 : i32
    scf.if %2 {
      %cst_16 = arith.constant 0.000000e+00 : f32
      %30 = vector.broadcast %cst_16 : f32 to vector<8x128xf32>
      %c0_17 = arith.constant 0 : index
      %c0_18 = arith.constant 0 : index
      %31 = vector.load %arg11[%c0_17, %c0_18] : memref<8x128xf32, #tpu.memory_space<vmem>>, vector<8x128xf32>
      tpu.vector_store %arg11[%c0_17, %c0_18], %30 {strides = array<i32>} : memref<8x128xf32, #tpu.memory_space<vmem>>, vector<8x128xf32>,
    } else {
    }
    %c0 = arith.constant 0 : index
    %c0_1 = arith.constant 0 : index
    %3 = vector.load %arg4[%c0, %c0_1] : memref<128x128xf32, #tpu.memory_space<vmem>>, vector<128x128xf32>
    %c0_2 = arith.constant 0 : index
    %c0_3 = arith.constant 0 : index
    %4 = vector.load %arg5[%c0_2, %c0_3] : memref<128x128xf32, #tpu.memory_space<vmem>>, vector<128x128xf32>
    %cst = arith.constant 0.000000e+00 : f32
    %5 = vector.broadcast %cst : f32 to vector<128x128xf32>
    %6 = arith.maximumf %4, %5 : vector<128x128xf32>
    %7 = vector.broadcast %cst : f32 to vector<128x128xf32>
    %8 = arith.subf %4, %7 : vector<128x128xf32>
    %9 = arith.cmpf one, %8, %8 : vector<128x128xf32>
    %10 = vector.broadcast %cst : f32 to vector<128x128xf32>
    %11 = arith.addf %4, %10 : vector<128x128xf32>
    %12 = math.absf %8 : vector<128x128xf32>
    %cst_4 = arith.constant 0.000000e+00 : f32
    %13 = vector.broadcast %cst_4 : f32 to vector<128x128xf32>
    %14 = arith.subf %13, %12 : vector<128x128xf32>
    %15 = math.exp %14 : vector<128x128xf32>
    %16 = math.log1p %15 : vector<128x128xf32>
    %17 = arith.addf %6, %16 : vector<128x128xf32>
    %18 = arith.select %9, %11, %17 : vector<128x128xi1>, vector<128x128xf32>
    %c0_5 = arith.constant 0 : index
    %c0_6 = arith.constant 0 : index
    %19 = vector.load %arg6[%c0_5, %c0_6] : memref<128x128xf32, #tpu.memory_space<vmem>>, vector<128x128xf32>
    %20 = arith.mulf %18, %19 : vector<128x128xf32>
    %21 = arith.addf %3, %20 : vector<128x128xf32>
    %c0_7 = arith.constant 0 : index
    %c0_8 = arith.constant 0 : index
    %22 = vector.load %arg11[%c0_7, %c0_8] : memref<8x128xf32, #tpu.memory_space<vmem>>, vector<8x128xf32>
    %c0_9 = arith.constant 0 : index
    %c0_10 = arith.constant 0 : index
    %23 = vector.load %arg3[%c0_9, %c0_10] : memref<8x128xf32, #tpu.memory_space<vmem>>, vector<8x128xf32>
    %cst_11 = arith.constant dense<0.000000e+00> : vector<8x128xf32>
    %24 = tpu.matmul %23, %21, %cst_11 {dimension_numbers = #tpu.dot_dimension_numbers<[1], [1], [0], [0], [0, 0, 1, 0], [], []>} : vector<8x128xf32>, vector<128x128xf32>, vector<8x128xf32> -> vector<8x128xf32>
    %25 = arith.addf %22, %24 : vector<8x128xf32>
    %c0_12 = arith.constant 0 : index
    %c0_13 = arith.constant 0 : index
    %26 = vector.load %arg11[%c0_12, %c0_13] : memref<8x128xf32, #tpu.memory_space<vmem>>, vector<8x128xf32>
    tpu.vector_store %arg11[%c0_12, %c0_13], %25 {strides = array<i32>} : memref<8x128xf32, #tpu.memory_space<vmem>>, vector<8x128xf32>,
    %c0_i32_14 = arith.constant 0 : i32
    %27 = arith.cmpi eq, %arg2, %c0_i32_14 : i32
    %28 = arith.extui %27 : i1 to i32
    %c0_i32_15 = arith.constant 0 : i32
    %29 = arith.cmpi ne, %28, %c0_i32_15 : i32
    scf.if %29 {
      %c0_16 = arith.constant 0 : index
      %c0_17 = arith.constant 0 : index
      %30 = vector.load %arg7[%c0_16, %c0_17] : memref<1x128xf32, #tpu.memory_space<vmem>>, vector<1x128xf32>
      %c0_18 = arith.constant 0 : index
      %c0_19 = arith.constant 0 : index
      %31 = vector.load %arg8[%c0_18, %c0_19] : memref<1x128xf32, #tpu.memory_space<vmem>>, vector<1x128xf32>
      %cst_20 = arith.constant 0.000000e+00 : f32
      %32 = vector.broadcast %cst_20 : f32 to vector<1x128xf32>
      %33 = arith.maximumf %31, %32 : vector<1x128xf32>
      %34 = vector.broadcast %cst_20 : f32 to vector<1x128xf32>
      %35 = arith.subf %31, %34 : vector<1x128xf32>
      %36 = arith.cmpf one, %35, %35 : vector<1x128xf32>
      %37 = vector.broadcast %cst_20 : f32 to vector<1x128xf32>
      %38 = arith.addf %31, %37 : vector<1x128xf32>
      %39 = math.absf %35 : vector<1x128xf32>
      %cst_21 = arith.constant 0.000000e+00 : f32
      %40 = vector.broadcast %cst_21 : f32 to vector<1x128xf32>
      %41 = arith.subf %40, %39 : vector<1x128xf32>
      %42 = math.exp %41 : vector<1x128xf32>
      %43 = math.log1p %42 : vector<1x128xf32>
      %44 = arith.addf %33, %43 : vector<1x128xf32>
      %45 = arith.select %36, %38, %44 : vector<1x128xi1>, vector<1x128xf32>
      %c0_22 = arith.constant 0 : index
      %c0_23 = arith.constant 0 : index
      %46 = vector.load %arg9[%c0_22, %c0_23] : memref<1x128xf32, #tpu.memory_space<vmem>>, vector<1x128xf32>
      %47 = arith.mulf %45, %46 : vector<1x128xf32>
      %48 = arith.addf %30, %47 : vector<1x128xf32>
      %c0_24 = arith.constant 0 : index
      %c0_25 = arith.constant 0 : index
      %49 = vector.load %arg11[%c0_24, %c0_25] : memref<8x128xf32, #tpu.memory_space<vmem>>, vector<8x128xf32>
      %50 = vector.broadcast %48 : vector<1x128xf32> to vector<8x128xf32>
      %51 = arith.addf %49, %50 : vector<8x128xf32>
      %c0_26 = arith.constant 0 : index
      %c0_27 = arith.constant 0 : index
      %52 = vector.load %arg10[%c0_26, %c0_27] : memref<8x128xf32, #tpu.memory_space<vmem>>, vector<8x128xf32>
      tpu.vector_store %arg10[%c0_26, %c0_27], %51 {strides = array<i32>} : memref<8x128xf32, #tpu.memory_space<vmem>>, vector<8x128xf32>,
    } else {
    }
    return
  }
  func.func @transform_0(%arg0: i32, %arg1: i32, %arg2: i32) -> (i32, i32) {
    %c0_i32 = arith.constant 0 : i32
    return %arg0, %arg2 : i32, i32
  }
  func.func @transform_1(%arg0: i32, %arg1: i32, %arg2: i32) -> (i32, i32) {
    %c0_i32 = arith.constant 0 : i32
    return %arg1, %arg2 : i32, i32
  }
  func.func @transform_2(%arg0: i32, %arg1: i32, %arg2: i32) -> (i32, i32) {
    %c0_i32 = arith.constant 0 : i32
    return %arg1, %arg2 : i32, i32
  }
  func.func @transform_3(%arg0: i32, %arg1: i32, %arg2: i32) -> (i32, i32) {
    %c0_i32 = arith.constant 0 : i32
    return %arg1, %arg2 : i32, i32
  }
  func.func @transform_4(%arg0: i32, %arg1: i32, %arg2: i32) -> (i32, i32) {
    %c0_i32 = arith.constant 0 : i32
    %c0_i32_0 = arith.constant 0 : i32
    return %c0_i32, %arg1 : i32, i32
  }
  func.func @transform_5(%arg0: i32, %arg1: i32, %arg2: i32) -> (i32, i32) {
    %c0_i32 = arith.constant 0 : i32
    %c0_i32_0 = arith.constant 0 : i32
    return %c0_i32, %arg1 : i32, i32
  }
  func.func @transform_6(%arg0: i32, %arg1: i32, %arg2: i32) -> (i32, i32) {
    %c0_i32 = arith.constant 0 : i32
    %c0_i32_0 = arith.constant 0 : i32
    return %c0_i32, %arg1 : i32, i32
  }
  func.func @transform_7(%arg0: i32, %arg1: i32, %arg2: i32) -> (i32, i32) {
    %c0_i32 = arith.constant 0 : i32
    return %arg0, %arg1 : i32, i32
  }
}

</mosaic_0001>

<bundles_post_ra>
// kernel: tpu_custom_call.1
= control target key start
LH: loop header
LB: loop body
LE: loop exit
PB: predicated region body
PF: predicated region fallthrough
CT: control target
= control target key end

     0   :  { %12 = vsyncpa [#allocation4], 0  ;;  %s1261_s0 = inlined_call_operand.hbm [shape: f32[8,128], index: 0, kind: input, shape index: {}]   ;;  %s1262_s1 = inlined_call_operand.hbm [shape: f32[128,128], index: 1, kind: input, shape index: {}]   ;;  %s1263_s2 = inlined_call_operand.hbm [shape: f32[128,128], index: 2, kind: input, shape index: {}]   ;;  %s1264_s3 = inlined_call_operand.hbm [shape: f32[128,128], index: 3, kind: input, shape index: {}]   ;;  %s1265_s4 = inlined_call_operand.vmem [shape: f32[1,128], index: 4, kind: input, shape index: {}]   ;;  %s1266_s5 = inlined_call_operand.vmem [shape: f32[1,128], index: 5, kind: input, shape index: {}]   ;;  %s1267_s6 = inlined_call_operand.vmem [shape: f32[1,128], index: 6, kind: input, shape index: {}]   ;;  %s1268_s7 = inlined_call_operand.hbm [shape: f32[8,128], index: 7, kind: output, shape index: {}]  }
   0x1   :  { %13 = vsyncpa [#allocation7], 0 }
   0x2   :  { %14 = vsyncpa [#allocation10], 0 }
   0x3   :  { %15 = vsyncpa [#allocation5], 0  ;;  %s851_s24 = smov [#allocation6]   ;;  %s733_s28 = scalar_lea.hbm %s1262_s1, 2048 }
   0x4   :  { %s31_s25 = sshll.u32 %s851_s24, 4  ;;  %p734_p0 = scmp.ne.s32.totalorder %s1262_s1, %s733_s28  ;;  %s32_s25 = int_to_ptr.vmem [resolvable:$true] %s31_s25 }
   0x5   :  { %p737_p1 = scmp.lt.u32.totalorder %s733_s28, %s1262_s1 }
   0x7   :  { %p739_p2 = pnand %p737_p1, %p734_p0 }
   0x9   :  { %742 = shalt.err (!%p739_p2)
}
   0xa   :  { %s743_s10 = scalar_lea.vmem %s32_s25, 2048  ;;  %p748_p4 = scmp.lt.s32.totalorder %s32_s25, %s32_s25 }
   0xb   :  { %p744_p3 = scmp.ne.s32.totalorder %s32_s25, %s743_s10  ;;  %p749_p5 = scmp.lt.s32.totalorder %s743_s10, %s743_s10 }
   0xd   :  { %p750_p6 = por %p749_p5, %p748_p4 }
   0xf   :  { %p751_p7 = pnand %p750_p6, %p744_p3 }
  0x11   :  { %754 = shalt.err (!%p751_p7)
}
  0x12   :  { %s852_s11 = smov 128   ;;  %s853_s12 = smov 8  }
  0x13   :  { %37 = dma.hbm_to_vmem [thread:$0]  %s1262_s1, 2048, %s32_s25, [#allocation7], %s852_s11, %s852_s11, %s853_s12  }
  0x14   :  { %s854_s15 = smov [#allocation3]   ;;  %s855_s17 = smov [#allocation8]  }
  0x15   :  { %s22_s16 = sshll.u32 %s854_s15, 4  ;;  %s43_s18 = sshll.u32 %s855_s17, 4  ;;  %s23_s16 = int_to_ptr.vmem [resolvable:$true] %s22_s16  ;;  %s44_s18 = int_to_ptr.vmem [resolvable:$true] %s43_s18 }
  0x16   :  { %s755_s21 = scalar_lea.hbm %s1261_s0, 128 }
  0x17   :  { %p756_p8 = scmp.ne.s32.totalorder %s1261_s0, %s755_s21  ;;  %p759_p9 = scmp.lt.u32.totalorder %s755_s21, %s1261_s0 }
  0x19   :  { %p761_p10 = pnand %p759_p9, %p756_p8 }
  0x1b   :  { %764 = shalt.err (!%p761_p10)
}
  0x1c   :  { %s765_s1 = scalar_lea.vmem %s23_s16, 128  ;;  %p770_p12 = scmp.lt.s32.totalorder %s23_s16, %s23_s16 }
  0x1d   :  { %p766_p11 = scmp.ne.s32.totalorder %s23_s16, %s765_s1  ;;  %p771_p13 = scmp.lt.s32.totalorder %s765_s1, %s765_s1 }
  0x1f   :  { %p772_p0 = por %p771_p13, %p770_p12 }
  0x21   :  { %p773_p1 = pnand %p772_p0, %p766_p11 }
  0x23   :  { %776 = shalt.err (!%p773_p1)
}
  0x24   :  { %25 = dma.hbm_to_vmem [thread:$0]  %s1261_s0, 128, %s23_s16, [#allocation4]  }
  0x25   :  { %s777_s30 = scalar_lea.hbm %s1263_s2, 2048 }
  0x26   :  { %p778_p2 = scmp.ne.s32.totalorder %s1263_s2, %s777_s30  ;;  %p781_p3 = scmp.lt.u32.totalorder %s777_s30, %s1263_s2 }
  0x28   :  { %p783_p4 = pnand %p781_p3, %p778_p2 }
  0x2a   :  { %786 = shalt.err (!%p783_p4)
}
  0x2b   :  { %s787_s14 = scalar_lea.vmem %s44_s18, 2048  ;;  %p792_p6 = scmp.lt.s32.totalorder %s44_s18, %s44_s18 }
  0x2c   :  { %p788_p5 = scmp.ne.s32.totalorder %s44_s18, %s787_s14  ;;  %p793_p7 = scmp.lt.s32.totalorder %s787_s14, %s787_s14 }
  0x2e   :  { %p794_p8 = por %p793_p7, %p792_p6 }
  0x30   :  { %p795_p9 = pnand %p794_p8, %p788_p5 }
  0x32   :  { %798 = shalt.err (!%p795_p9)
}
  0x33   :  { %49 = dma.hbm_to_vmem [thread:$0]  %s1263_s2, 2048, %s44_s18, [#allocation7], %s852_s11, %s852_s11, %s853_s12  }
  0x34   :  { %s856_s16 = smov [#allocation9]   ;;  %s799_s21 = scalar_lea.hbm %s1264_s3, 2048 }
  0x35   :  { %s55_s17 = sshll.u32 %s856_s16, 4  ;;  %p800_p10 = scmp.ne.s32.totalorder %s1264_s3, %s799_s21  ;;  %s56_s17 = int_to_ptr.vmem [resolvable:$true] %s55_s17 }
  0x36   :  { %p803_p11 = scmp.lt.u32.totalorder %s799_s21, %s1264_s3 }
  0x38   :  { %p805_p12 = pnand %p803_p11, %p800_p10 }
  0x3a   :  { %808 = shalt.err (!%p805_p12)
}
  0x3b   :  { %s809_s1 = scalar_lea.vmem %s56_s17, 2048  ;;  %p814_p0 = scmp.lt.s32.totalorder %s56_s17, %s56_s17 }
  0x3c   :  { %p810_p13 = scmp.ne.s32.totalorder %s56_s17, %s809_s1  ;;  %p815_p1 = scmp.lt.s32.totalorder %s809_s1, %s809_s1 }
  0x3e   :  { %p816_p2 = por %p815_p1, %p814_p0 }
  0x40   :  { %p817_p3 = pnand %p816_p2, %p810_p13 }
  0x42   :  { %820 = shalt.err (!%p817_p3)
}
  0x43   :  { %61 = dma.hbm_to_vmem [thread:$0]  %s1264_s3, 2048, %s56_s17, [#allocation10], %s852_s11, %s852_s11, %s853_s12  }
  0x44   :  { %843 = dma.done.wait [#allocation4], 128  }
  0x45   :  { %844 = vsyncadd [#allocation4], 4294967168 }
  0x46   :  { %845 = dma.done.wait [#allocation7], 4096  }
  0x47   :  { %846 = vsyncadd [#allocation7], 4294963200 }
  0x48   :  { %847 = dma.done.wait [#allocation10], 2048  }
  0x49   :  { %848 = vsyncadd [#allocation10], 4294965248  ;;  %v857_v0 = vmov 0.0|0.0   ;;  %vm858_vm0 = vmmov 0   ;;  %v859_v1 = vmov 0.0   ;;  %v959_v2 = vld [vmem:[#allocation8] sm:$0xff] }
  0x4a   :  { %631 = vmatprep.subr.bf16.mxu0 %v857_v0  ;;  %628 = vmatprep.mubr.msk.f32.mxu0 %vm858_vm0, %v859_v1  ;;  %v961_v3 = vld [vmem:[#allocation8 + $0x8] sm:$0xff]  ;;  %v165_v4 = vand.u32 2147483647, %v959_v2  ;;  %v965_v6 = vld [vmem:[#allocation8 + $0x10] sm:$0xff]  ;;  %v967_v8 = vld [vmem:[#allocation8 + $0x18] sm:$0xff]  ;;  %v117_v32 = vmax.f32 %v959_v2, 0.0  ;;  %vm133_vm3 = vcmp.ne.f32.partialorder %v959_v2, %v959_v2 }
  0x4b   :  { %v166_v5 = vand.u32 2147483647, %v961_v3  ;;  %v167_v9 = vand.u32 2147483647, %v965_v6  ;;  %v168_v11 = vand.u32 2147483647, %v967_v8  ;;  %vm134_vm5 = vcmp.ne.f32.partialorder %v961_v3, %v961_v3 }
  0x4c   :  { %v181_v7 = vsub.f32 0.0, %v165_v4  ;;  %v971_v14 = vld [vmem:[#allocation8 + $0x20] sm:$0xff]  ;;  %v973_v15 = vld [vmem:[#allocation8 + $0x28] sm:$0xff]  ;;  %v977_v22 = vld [vmem:[#allocation8 + $0x30] sm:$0xff]  ;;  %v118_v37 = vmax.f32 %v961_v3, 0.0  ;;  %v119_v38 = vmax.f32 %v965_v6, 0.0  ;;  %vm135_vm6 = vcmp.ne.f32.partialorder %v965_v6, %v965_v6 }
  0x4d   :  { %v182_v10 = vsub.f32 0.0, %v166_v5  ;;  %v183_v13 = vsub.f32 0.0, %v167_v9  ;;  %v184_v17 = vsub.f32 0.0, %v168_v11  ;;  %v169_v20 = vand.u32 2147483647, %v971_v14  ;;  %v979_v23 = vld [vmem:[#allocation8 + $0x38] sm:$0xff] }
  0x4e   :  { %v197_v12 = vmul.f32 1.442695, %v181_v7  ;;  %v170_v21 = vand.u32 2147483647, %v973_v15  ;;  %v171_v26 = vand.u32 2147483647, %v977_v22  ;;  %vm136_vm8 = vcmp.ne.f32.partialorder %v967_v8, %v967_v8 }
  0x4f   :  { %v199_v16 = vmul.f32 1.442695, %v182_v10  ;;  %v201_v18 = vmul.f32 1.442695, %v183_v13  ;;  %v203_v19 = vmul.f32 1.442695, %v184_v17  ;;  %vm137_vm11 = vcmp.ne.f32.partialorder %v971_v14, %v971_v14 }
  0x50   :  { %665 = vpow2.f32 %v197_v12  ;;  %v185_v24 = vsub.f32 0.0, %v169_v20  ;;  %v186_v25 = vsub.f32 0.0, %v170_v21  ;;  %v982_v27 = vld [vmem:[#allocation8 + $0x40] sm:$0xff]  ;;  %v984_v28 = vld [vmem:[#allocation8 + $0x48] sm:$0xff]  ;;  %v172_v31 = vand.u32 2147483647, %v979_v23 }
  0x51   :  { %667 = vpow2.f32 %v199_v16  ;;  %v187_v33 = vsub.f32 0.0, %v171_v26  ;;  %v173_v35 = vand.u32 2147483647, %v982_v27  ;;  %v174_v36 = vand.u32 2147483647, %v984_v28  ;;  %v997_v48 = vld [vmem:[#allocation8 + $0x50] sm:$0xff] }
  0x52   :  { %669 = vpow2.f32 %v201_v18  ;;  %v205_v29 = vmul.f32 1.442695, %v185_v24  ;;  %v207_v30 = vmul.f32 1.442695, %v186_v25  ;;  %v188_v34 = vsub.f32 0.0, %v172_v31  ;;  %v999_v53 = vld [vmem:[#allocation8 + $0x58] sm:$0xff] }
  0x53   :  { %671 = vpow2.f32 %v203_v19  ;;  %v209_v39 = vmul.f32 1.442695, %v187_v33  ;;  %v120_v40 = vmax.f32 %v967_v8, 0.0  ;;  %v121_v41 = vmax.f32 %v971_v14, 0.0  ;;  %s860_s28 = smov [#allocation11]  }
  0x54   :  { %673 = vpow2.f32 %v205_v29  ;;  %v122_v42 = vmax.f32 %v973_v15, 0.0  ;;  %v211_v43 = vmul.f32 1.442695, %v188_v34  ;;  %v123_v45 = vmax.f32 %v977_v22, 0.0  ;;  %s568_s29 = sshll.u32 %s860_s28, 4  ;;  %s569_s29 = int_to_ptr.vmem [resolvable:$true] %s568_s29 }
  0x55   :  { %675 = vpow2.f32 %v207_v30  ;;  %v124_v46 = vmax.f32 %v979_v23, 0.0  ;;  %v189_v47 = vsub.f32 0.0, %v173_v35  ;;  %v190_v52 = vsub.f32 0.0, %v174_v36  ;;  %s821_s30 = scalar_lea.vmem %s569_s29, 128  ;;  %p826_p5 = scmp.lt.s32.totalorder %s569_s29, %s569_s29 }
  0x56   :  { %677 = vpow2.f32 %v209_v39  ;;  %v175_v62 = vand.u32 2147483647, %v997_v48  ;;  %v176_v4 = vand.u32 2147483647, %v999_v53  ;;  %vm138_vm12 = vcmp.ne.f32.partialorder %v973_v15, %v973_v15  ;;  %p822_p4 = scmp.ne.s32.totalorder %s569_s29, %s821_s30  ;;  %p827_p6 = scmp.lt.s32.totalorder %s821_s30, %s821_s30 }
  0x57   :  { %679 = vpow2.f32 %v211_v43  ;;  %v213_v9 = vmul.f32 1.442695, %v189_v47  ;;  %v215_v26 = vmul.f32 1.442695, %v190_v52  ;;  %vm139_vm15 = vcmp.ne.f32.partialorder %v977_v22, %v977_v22 }
  0x58   :  { %v191_v39 = vsub.f32 0.0, %v175_v62  ;;  %vm140_vm0 = vcmp.ne.f32.partialorder %v979_v23, %v979_v23  ;;  %p828_p7 = por %p827_p6, %p826_p5 }
  0x5a   :  { %v666_v44 = vpop.eup %665  ;;  %p829_p8 = pnand %p828_p7, %p822_p4 }
  0x5b   :  { %v668_v49 = vpop.eup %667  ;;  %v229_v50 = vadd.f32 1.0, %v666_v44  ;;  %v232_v51 = vmul.f32 -0.5, %v666_v44  ;;  %v235_v55 = vand.u32 2147483647, %v666_v44 }
  0x5c   :  { %v670_v54 = vpop.eup %669  ;;  %v238_v56 = vadd.f32 1.0, %v668_v49  ;;  %v241_v57 = vmul.f32 -0.5, %v668_v49  ;;  %v244_v58 = vand.u32 2147483647, %v668_v49 }
  0x5d   :  { %v672_v59 = vpop.eup %671  ;;  %681 = vlog2.f32 %v229_v50  ;;  %v233_v60 = vadd.f32 1.0, %v232_v51  ;;  %v247_v61 = vadd.f32 1.0, %v670_v54  ;;  %v250_v1 = vmul.f32 -0.5, %v670_v54 }
  0x5e   :  { %683 = vlog2.f32 %v238_v56  ;;  %v242_v63 = vadd.f32 1.0, %v241_v57  ;;  %v253_v5 = vand.u32 2147483647, %v670_v54  ;;  %v256_v7 = vadd.f32 1.0, %v672_v59  ;;  %v674_v16 = vpop.eup %673 }
  0x5f   :  { %685 = vlog2.f32 %v247_v61  ;;  %vm1003_vm1 = vcmp.lt.f32.partialorder %v235_v55, 0.0004427343  ;;  %vm1007_vm2 = vcmp.lt.f32.partialorder %v244_v58, 0.0004427343  ;;  %v251_v12 = vadd.f32 1.0, %v250_v1  ;;  %v676_v20 = vpop.eup %675  ;;  %v409_v1 = vld [vmem:[#allocation9 + $0x20] sm:$0xff] }
  0x60   :  { %v259_v13 = vmul.f32 -0.5, %v672_v59  ;;  %v234_v17 = vmul.f32 %v666_v44, %v233_v60  ;;  %v243_v18 = vmul.f32 %v668_v49, %v242_v63  ;;  %687 = vlog2.f32 %v256_v7  ;;  %v678_v34 = vpop.eup %677  ;;  %v87_v44 = vld [vmem:[#allocation6 + $0x10] sm:$0xff] }
  0x61   :  { %v262_v19 = vand.u32 2147483647, %v672_v59  ;;  %vm1013_vm4 = vcmp.lt.f32.partialorder %v253_v5, 0.0004427343  ;;  %v265_v25 = vadd.f32 1.0, %v674_v16  ;;  %v268_v29 = vmul.f32 -0.5, %v674_v16  ;;  %v1021_v43 = vpop.eup %679 }
  0x62   :  { %v260_v24 = vadd.f32 1.0, %v259_v13  ;;  %v271_v30 = vand.u32 2147483647, %v674_v16  ;;  %v274_v31 = vadd.f32 1.0, %v676_v20  ;;  %v277_v33 = vmul.f32 -0.5, %v676_v20 }
  0x63   :  { %v252_v35 = vmul.f32 %v670_v54, %v251_v12  ;;  %689 = vlog2.f32 %v265_v25  ;;  %v280_v36 = vand.u32 2147483647, %v676_v20  ;;  %vm1023_vm7 = vcmp.lt.f32.partialorder %v262_v19, 0.0004427343  ;;  %v405_v25 = vld [vmem:[#allocation9] sm:$0xff] }
  0x64   :  { %v269_v47 = vadd.f32 1.0, %v268_v29  ;;  %691 = vlog2.f32 %v274_v31  ;;  %v278_v49 = vadd.f32 1.0, %v277_v33  ;;  %v261_v50 = vmul.f32 %v672_v59, %v260_v24 }
  0x65   :  { %v283_v51 = vadd.f32 1.0, %v678_v34  ;;  %v286_v52 = vmul.f32 -0.5, %v678_v34  ;;  %v289_v55 = vand.u32 2147483647, %v678_v34  ;;  %vm1029_vm9 = vcmp.lt.f32.partialorder %v271_v30, 0.0004427343 }
  0x66   :  { %v292_v57 = vadd.f32 1.0, %v1021_v43  ;;  %v295_v58 = vmul.f32 -0.5, %v1021_v43  ;;  %v192_v60 = vsub.f32 0.0, %v176_v4  ;;  %v270_v63 = vmul.f32 %v674_v16, %v269_v47  ;;  %v406_v30 = vld [vmem:[#allocation9 + $0x8] sm:$0xff] }
  0x67   :  { %v682_v54 = vpop.eup %681  ;;  %vm1035_vm10 = vcmp.lt.f32.partialorder %v280_v36, 0.0004427343  ;;  %693 = vlog2.f32 %v283_v51  ;;  %v279_v7 = vmul.f32 %v676_v20, %v278_v49  ;;  %v287_v12 = vadd.f32 1.0, %v286_v52 }
  0x68   :  { %v684_v61 = vpop.eup %683  ;;  %v231_v62 = vmul.f32 0.6931472, %v682_v54  ;;  %695 = vlog2.f32 %v292_v57  ;;  %vm1045_vm13 = vcmp.lt.f32.partialorder %v289_v55, 0.0004427343  ;;  %v296_v29 = vadd.f32 1.0, %v295_v58  ;;  %v408_v55 = vld [vmem:[#allocation9 + $0x18] sm:$0xff] }
  0x69   :  { %v686_v59 = vpop.eup %685  ;;  %v240_v5 = vmul.f32 0.6931472, %v684_v61  ;;  %697 = vpow2.f32 %v213_v9  ;;  %v298_v10 = vand.u32 2147483647, %v1021_v43  ;;  %v85_v9 = vld [vmem:[#allocation6] sm:$0xff]  ;;  %v288_v51 = vmul.f32 %v678_v34, %v287_v12  ;;  %v88_v61 = vld [vmem:[#allocation6 + $0x18] sm:$0xff] }
  0x6a   :  { %v237_v13 = vsel %vm1003_vm1, %v234_v17, %v231_v62  ;;  %v249_v4 = vmul.f32 0.6931472, %v686_v59  ;;  %v688_v19 = vpop.eup %687  ;;  %699 = vpow2.f32 %v215_v26  ;;  %v217_v36 = vmul.f32 1.442695, %v191_v39 }
  0x6b   :  { %v246_v24 = vsel %vm1007_vm2, %v243_v18, %v240_v5  ;;  %v373_v20 = vadd.f32 %v237_v13, %v117_v32  ;;  %v258_v33 = vmul.f32 0.6931472, %v688_v19  ;;  %v407_v18 = vld [vmem:[#allocation9 + $0x10] sm:$0xff]  ;;  %v219_v47 = vmul.f32 1.442695, %v192_v60 }
  0x6c   :  { %v374_v17 = vadd.f32 %v246_v24, %v118_v37  ;;  %v255_v31 = vsel %vm1013_vm4, %v252_v35, %v249_v4  ;;  %v86_v37 = vld [vmem:[#allocation6 + $0x8] sm:$0xff]  ;;  %701 = vpow2.f32 %v217_v36  ;;  %v297_v5 = vmul.f32 %v1021_v43, %v296_v29 }
  0x6d   :  { %v389_v11 = vsel %vm133_vm3, %v959_v2, %v373_v20  ;;  %v375_v32 = vadd.f32 %v255_v31, %v119_v38  ;;  %v690_v49 = vpop.eup %689  ;;  %v264_v35 = vsel %vm1023_vm7, %v261_v50, %v258_v33  ;;  %703 = vpow2.f32 %v219_v47  ;;  %v410_v43 = vld [vmem:[#allocation9 + $0x28] sm:$0xff]  ;;  %v412_v47 = vld [vmem:[#allocation9 + $0x38] sm:$0xff] }
  0x6e   :  { %v390_v21 = vsel %vm134_vm5, %v961_v3, %v374_v17  ;;  %v421_v26 = vmul.f32 %v405_v25, %v389_v11  ;;  %v692_v52 = vpop.eup %691  ;;  %v376_v38 = vadd.f32 %v264_v35, %v120_v40  ;;  %v267_v54 = vmul.f32 0.6931472, %v690_v49  ;;  %v90_v31 = vld [vmem:[#allocation6 + $0x28] sm:$0xff] }
  0x6f   :  { %v422_v2 = vmul.f32 %v406_v30, %v390_v21  ;;  %v391_v39 = vsel %vm135_vm6, %v965_v6, %v375_v32  ;;  %v276_v3 = vmul.f32 0.6931472, %v692_v52  ;;  %vm1089_vm14 = vcmp.lt.f32.partialorder %v298_v10, 0.0004427343  ;;  %v89_v30 = vld [vmem:[#allocation6 + $0x20] sm:$0xff] }
  0x70   :  { %v437_v57 = vadd.f32 %v421_v26, %v85_v9  ;;  %v423_v58 = vmul.f32 %v407_v18, %v391_v39  ;;  %v392_v34 = vsel %vm136_vm8, %v967_v8, %v376_v38  ;;  %v273_v40 = vsel %vm1029_vm9, %v270_v63, %v267_v54  ;;  %v1135_v39 = vld [vmem:[#allocation8 + $0x60] sm:$0xff]  ;;  %v91_v54 = vld [vmem:[#allocation6 + $0x30] sm:$0xff] }
  0x71   :  { %v438_v60 = vadd.f32 %v422_v2, %v86_v37  ;;  %v694_v50 = vpop.eup %693  ;;  %v424_v6 = vmul.f32 %v408_v55, %v392_v34  ;;  %v282_v62 = vsel %vm1035_vm10, %v279_v7, %v276_v3  ;;  %v377_v59 = vadd.f32 %v273_v40, %v121_v41  ;;  %v1137_v55 = vld [vmem:[#allocation8 + $0x68] sm:$0xff] }
  0x72   :  { %v696_v12 = vpop.eup %695  ;;  %v378_v8 = vadd.f32 %v282_v62, %v122_v42  ;;  %v285_v4 = vmul.f32 0.6931472, %v694_v50  ;;  %v439_v19 = vadd.f32 %v423_v58, %v87_v44  ;;  %v125_v26 = vmax.f32 %v982_v27, 0.0  ;;  %v1146_v50 = vld [vmem:[#allocation8 + $0x70] sm:$0xff] }
  0x73   :  { %v632_v13 = vpack.c.bf16 %v438_v60, %v437_v57  ;;  %v1093_v63 = vpop.eup %697  ;;  %v393_v41 = vsel %vm137_vm11, %v971_v14, %v377_v59  ;;  %v294_v7 = vmul.f32 0.6931472, %v696_v12  ;;  %v440_v24 = vadd.f32 %v424_v6, %v88_v61  ;;  %v92_v57 = vld [vmem:[#allocation6 + $0x38] sm:$0xff] }
  0x74   :  { %v394_v42 = vsel %vm138_vm12, %v973_v15, %v378_v8  ;;  %v291_v20 = vsel %vm1045_vm13, %v288_v51, %v285_v4  ;;  %v301_v25 = vadd.f32 1.0, %v1093_v63  ;;  %v1106_v29 = vpop.eup %699  ;;  %v425_v16 = vmul.f32 %v409_v1, %v393_v41  ;;  %v1148_v61 = vld [vmem:[#allocation8 + $0x78] sm:$0xff] }
  0x75   :  { %633 = vmatpush3.bf16.xpose.msra.mxu0 %v632_v13  ;;  %v300_v14 = vsel %vm1089_vm14, %v297_v5, %v294_v7  ;;  %v379_v15 = vadd.f32 %v291_v20, %v123_v45  ;;  %v426_v10 = vmul.f32 %v410_v43, %v394_v42  ;;  %v304_v33 = vmul.f32 -0.5, %v1093_v63  ;;  %v411_v45 = vld [vmem:[#allocation9 + $0x30] sm:$0xff] }
  0x76   :  { %634 = vmatprep.subr.bf16.mxu0 %v857_v0  ;;  %v380_v17 = vadd.f32 %v300_v14, %v124_v46  ;;  %705 = vlog2.f32 %v301_v25  ;;  %v310_v9 = vadd.f32 1.0, %v1106_v29  ;;  %v635_v11 = vpack.c.bf16 %v440_v24, %v439_v19  ;;  %v1121_v32 = vpop.eup %701 }
  0x77   :  { %v395_v18 = vsel %vm139_vm15, %v977_v22, %v379_v15  ;;  %v1125_v49 = vpop.eup %703  ;;  %v441_v46 = vadd.f32 %v425_v16, %v89_v30  ;;  %v442_v37 = vadd.f32 %v426_v10, %v90_v31  ;;  %v313_v21 = vmul.f32 -0.5, %v1106_v29 }
  0x78   :  { %v396_v36 = vsel %vm140_vm0, %v979_v23, %v380_v17  ;;  %707 = vlog2.f32 %v310_v9  ;;  %vm141_vm1 = vcmp.ne.f32.partialorder %v982_v27, %v982_v27  ;;  %v305_v35 = vadd.f32 1.0, %v304_v33  ;;  %v413_v33 = vld [vmem:[#allocation9 + $0x40] sm:$0xff] }
  0x79   :  { %v307_v51 = vand.u32 2147483647, %v1093_v63  ;;  %v319_v22 = vadd.f32 1.0, %v1121_v32  ;;  %v427_v23 = vmul.f32 %v411_v45, %v395_v18  ;;  %v428_v52 = vmul.f32 %v412_v47, %v396_v36 }
  0x7a   :  { %v316_v2 = vand.u32 2147483647, %v1106_v29  ;;  %v328_v38 = vadd.f32 1.0, %v1125_v49  ;;  %v126_v58 = vmax.f32 %v984_v28, 0.0  ;;  %v127_v3 = vmax.f32 %v997_v48, 0.0 }
  0x7b   :  { %709 = vlog2.f32 %v319_v22  ;;  %v322_v60 = vmul.f32 -0.5, %v1121_v32  ;;  %v638_v44 = vpack.c.bf16 %v442_v37, %v441_v46  ;;  %vm142_vm2 = vcmp.ne.f32.partialorder %v984_v28, %v984_v28  ;;  %v414_v37 = vld [vmem:[#allocation9 + $0x48] sm:$0xff] }
  0x7c   :  { %v314_v34 = vadd.f32 1.0, %v313_v21  ;;  %711 = vlog2.f32 %v328_v38  ;;  %v331_v40 = vmul.f32 -0.5, %v1125_v49  ;;  %v306_v6 = vmul.f32 %v1093_v63, %v305_v35 }
  0x7d   :  { %636 = vmatpush3.bf16.xpose.msra.mxu0 %v635_v11  ;;  %vm1151_vm3 = vcmp.lt.f32.partialorder %v307_v51, 0.0004427343  ;;  %v177_v59 = vand.u32 2147483647, %v1135_v39  ;;  %v178_v5 = vand.u32 2147483647, %v1137_v55  ;;  %v443_v13 = vadd.f32 %v427_v23, %v91_v54 }
  0x7e   :  { %637 = vmatprep.subr.bf16.mxu0 %v857_v0  ;;  %v444_v8 = vadd.f32 %v428_v52, %v92_v57  ;;  %vm1157_vm4 = vcmp.lt.f32.partialorder %v316_v2, 0.0004427343  ;;  %v325_v56 = vand.u32 2147483647, %v1121_v32  ;;  %v323_v41 = vadd.f32 1.0, %v322_v60  ;;  %v94_v52 = vld [vmem:[#allocation6 + $0x48] sm:$0xff] }
  0x7f   :  { %v193_v63 = vsub.f32 0.0, %v177_v59  ;;  %v194_v1 = vsub.f32 0.0, %v178_v5  ;;  %v315_v43 = vmul.f32 %v1106_v29, %v314_v34  ;;  %v332_v7 = vadd.f32 1.0, %v331_v40  ;;  %v415_v40 = vld [vmem:[#allocation9 + $0x50] sm:$0xff]  ;;  %v417_v23 = vld [vmem:[#allocation9 + $0x60] sm:$0xff] }
  0x80   :  { %v706_v12 = vpop.eup %705  ;;  %v179_v24 = vand.u32 2147483647, %v1146_v50  ;;  %v180_v42 = vand.u32 2147483647, %v1148_v61  ;;  %v334_v14 = vand.u32 2147483647, %v1125_v49  ;;  %v641_v29 = vpack.c.bf16 %v444_v8, %v443_v13 }
  0x81   :  { %v303_v19 = vmul.f32 0.6931472, %v706_v12  ;;  %v221_v15 = vmul.f32 1.442695, %v193_v63  ;;  %v223_v16 = vmul.f32 1.442695, %v194_v1  ;;  %v324_v11 = vmul.f32 %v1121_v32, %v323_v41 }
  0x82   :  { %v708_v20 = vpop.eup %707  ;;  %v195_v30 = vsub.f32 0.0, %v179_v24  ;;  %v196_v31 = vsub.f32 0.0, %v180_v42  ;;  %v128_v9 = vmax.f32 %v999_v53, 0.0  ;;  %vm1177_vm5 = vcmp.lt.f32.partialorder %v325_v56, 0.0004427343  ;;  %v95_v56 = vld [vmem:[#allocation6 + $0x50] sm:$0xff] }
  0x83   :  { %v309_v25 = vsel %vm1151_vm3, %v306_v6, %v303_v19  ;;  %v312_v10 = vmul.f32 0.6931472, %v708_v20  ;;  %713 = vpow2.f32 %v221_v15  ;;  %v333_v32 = vmul.f32 %v1125_v49, %v332_v7  ;;  %v416_v6 = vld [vmem:[#allocation9 + $0x58] sm:$0xff] }
  0x84   :  { %v381_v17 = vadd.f32 %v309_v25, %v125_v26  ;;  %715 = vpow2.f32 %v223_v16  ;;  %v225_v45 = vmul.f32 1.442695, %v195_v30  ;;  %v227_v26 = vmul.f32 1.442695, %v196_v31 }
  0x85   :  { %639 = vmatpush3.bf16.xpose.msra.mxu0 %v638_v44  ;;  %v318_v18 = vsel %vm1157_vm4, %v315_v43, %v312_v10  ;;  %v710_v47 = vpop.eup %709  ;;  %vm1182_vm6 = vcmp.lt.f32.partialorder %v334_v14, 0.0004427343  ;;  %vm143_vm7 = vcmp.ne.f32.partialorder %v997_v48, %v997_v48  ;;  %vm144_vm8 = vcmp.ne.f32.partialorder %v999_v53, %v999_v53 }
  0x86   :  { %640 = vmatprep.subr.bf16.mxu0 %v857_v0  ;;  %v397_v36 = vsel %vm141_vm1, %v982_v27, %v381_v17  ;;  %v382_v46 = vadd.f32 %v318_v18, %v126_v58  ;;  %v712_v35 = vpop.eup %711  ;;  %v321_v22 = vmul.f32 0.6931472, %v710_v47  ;;  %717 = vpow2.f32 %v225_v45  ;;  %v93_v27 = vld [vmem:[#allocation6 + $0x40] sm:$0xff] }
  0x87   :  { %v429_v51 = vmul.f32 %v413_v33, %v397_v36  ;;  %v330_v38 = vmul.f32 0.6931472, %v712_v35  ;;  %719 = vpow2.f32 %v227_v26  ;;  %v129_v17 = vmax.f32 %v1135_v39, 0.0 }
  0x88   :  { %v398_v2 = vsel %vm142_vm2, %v984_v28, %v382_v46  ;;  %v327_v49 = vsel %vm1177_vm5, %v324_v11, %v321_v22  ;;  %v130_v30 = vmax.f32 %v1137_v55, 0.0  ;;  %vm145_vm11 = vcmp.ne.f32.partialorder %v1135_v39, %v1135_v39 }
  0x89   :  { %v430_v54 = vmul.f32 %v414_v37, %v398_v2  ;;  %v336_v57 = vsel %vm1182_vm6, %v333_v32, %v330_v38  ;;  %v383_v58 = vadd.f32 %v327_v49, %v127_v3  ;;  %v445_v28 = vadd.f32 %v429_v51, %v93_v27  ;;  %v96_v3 = vld [vmem:[#allocation6 + $0x58] sm:$0xff] }
  0x8a   :  { %v384_v44 = vadd.f32 %v336_v57, %v128_v9  ;;  %vm146_vm12 = vcmp.ne.f32.partialorder %v1137_v55, %v1137_v55  ;;  %v131_v32 = vmax.f32 %v1146_v50, 0.0  ;;  %v132_v49 = vmax.f32 %v1148_v61, 0.0 }
  0x8b   :  { %v446_v60 = vadd.f32 %v430_v54, %v94_v52  ;;  %v399_v34 = vsel %vm143_vm7, %v997_v48, %v383_v58  ;;  %v418_v54 = vld [vmem:[#allocation9 + $0x68] sm:$0xff]  ;;  %v97_v58 = vld [vmem:[#allocation6 + $0x60] sm:$0xff]  ;;  %vm147_vm15 = vcmp.ne.f32.partialorder %v1146_v50, %v1146_v50  ;;  %vm148_vm0 = vcmp.ne.f32.partialorder %v1148_v61, %v1148_v61 }
  0x8c   :  { %v400_v62 = vsel %vm144_vm8, %v999_v53, %v384_v44  ;;  %v431_v13 = vmul.f32 %v415_v40, %v399_v34  ;;  %v98_v44 = vld [vmem:[#allocation6 + $0x68] sm:$0xff] }
  0x8d   :  { %642 = vmatpush3.bf16.xpose.msra.mxu0 %v641_v29  ;;  %v714_v59 = vpop.eup %713  ;;  %v644_v12 = vpack.c.bf16 %v446_v60, %v445_v28  ;;  %v432_v8 = vmul.f32 %v416_v6, %v400_v62 }
  0x8e   :  { %643 = vmatprep.subr.bf16.mxu0 %v857_v0  ;;  %v716_v5 = vpop.eup %715  ;;  %v337_v4 = vadd.f32 1.0, %v714_v59  ;;  %v340_v1 = vmul.f32 -0.5, %v714_v59  ;;  %v447_v48 = vadd.f32 %v431_v13, %v95_v56  ;;  %v343_v14 = vand.u32 2147483647, %v714_v59  ;;  %v99_v56 = vld [vmem:[#allocation6 + $0x70] sm:$0xff] }
  0x8f   :  { %v346_v19 = vadd.f32 1.0, %v716_v5  ;;  %v448_v43 = vadd.f32 %v432_v8, %v96_v3  ;;  %v349_v7 = vmul.f32 -0.5, %v716_v5  ;;  %v352_v10 = vand.u32 2147483647, %v716_v5  ;;  %v420_v8 = vld [vmem:[#allocation9 + $0x78] sm:$0xff] }
  0x90   :  { %v718_v41 = vpop.eup %717  ;;  %721 = vlog2.f32 %v337_v4  ;;  %v341_v42 = vadd.f32 1.0, %v340_v1  ;;  %vm1206_vm9 = vcmp.lt.f32.partialorder %v343_v14, 0.0004427343  ;;  %v100_v3 = vld [vmem:[#allocation6 + $0x78] sm:$0xff] }
  0x91   :  { %v720_v63 = vpop.eup %719  ;;  %723 = vlog2.f32 %v346_v19  ;;  %v355_v24 = vadd.f32 1.0, %v718_v41  ;;  %v358_v20 = vmul.f32 -0.5, %v718_v41  ;;  %v647_v25 = vpack.c.bf16 %v448_v43, %v447_v48 }
  0x92   :  { %v364_v53 = vadd.f32 1.0, %v720_v63  ;;  %v350_v15 = vadd.f32 1.0, %v349_v7  ;;  %v367_v16 = vmul.f32 -0.5, %v720_v63  ;;  %v342_v31 = vmul.f32 %v714_v59, %v341_v42 }
  0x93   :  { %725 = vlog2.f32 %v355_v24  ;;  %v359_v29 = vadd.f32 1.0, %v358_v20  ;;  %v361_v18 = vand.u32 2147483647, %v718_v41  ;;  %vm353_vm10 = vcmp.lt.f32.partialorder %v352_v10, 0.0004427343  ;;  %v454_v24 = vld [vmem:[#allocation3] sm:$0xff] }
  0x94   :  { %727 = vlog2.f32 %v364_v53  ;;  %v351_v11 = vmul.f32 %v716_v5, %v350_v15  ;;  %v368_v36 = vadd.f32 1.0, %v367_v16  ;;  %v370_v46 = vand.u32 2147483647, %v720_v63  ;;  %v419_v5 = vld [vmem:[#allocation9 + $0x70] sm:$0xff] }
  0x95   :  { %645 = vmatpush3.bf16.xpose.msra.mxu0 %v644_v12  ;;  %v360_v26 = vmul.f32 %v718_v41, %v359_v29  ;;  %vm1218_vm13 = vcmp.lt.f32.partialorder %v361_v18, 0.0004427343 }
  0x96   :  { %646 = vmatprep.subr.bf16.mxu0 %v857_v0  ;;  %v369_v52 = vmul.f32 %v720_v63, %v368_v36  ;;  %vm371_vm14 = vcmp.lt.f32.partialorder %v370_v46, 0.0004427343 }
  0x9a   :  { %v722_v33 = vpop.eup %721 }
  0x9b   :  { %v724_v45 = vpop.eup %723  ;;  %v339_v47 = vmul.f32 0.6931472, %v722_v33  ;;  %v555_v33 = vlaneseq }
  0x9c   :  { %v348_v37 = vmul.f32 0.6931472, %v724_v45  ;;  %v530_v45 = vld [vmem:[%s1265_s4] sm:$0x1] }
  0x9d   :  { %648 = vmatpush3.bf16.xpose.msra.mxu0 %v647_v25  ;;  %v345_v21 = vsel %vm1206_vm9, %v342_v31, %v339_v47  ;;  %v726_v35 = vpop.eup %725  ;;  %v556_v36 = vshrl.u32 %v555_v33, 7 }
  0x9e   :  { %649 = vmatprep.subr.bf16.mxu0 %v857_v0  ;;  %v354_v51 = vsel %vm353_vm10, %v351_v11, %v348_v37  ;;  %v385_v22 = vadd.f32 %v345_v21, %v129_v17  ;;  %v728_v2 = vpop.eup %727  ;;  %v357_v57 = vmul.f32 0.6931472, %v726_v35  ;;  %v550_v11 = vld [vmem:[%s1267_s6] sm:$0x1] }
  0x9f   :  { %v386_v38 = vadd.f32 %v354_v51, %v130_v30  ;;  %v366_v60 = vmul.f32 0.6931472, %v728_v2  ;;  %v557_v46 = vsub.s32 0, %v556_v36 }
  0xa0   :  { %v401_v28 = vsel %vm145_vm11, %v1135_v39, %v385_v22  ;;  %v363_v6 = vsel %vm1218_vm13, %v360_v26, %v357_v57 }
  0xa1   :  { %v402_v34 = vsel %vm146_vm12, %v1137_v55, %v386_v38  ;;  %v433_v40 = vmul.f32 %v417_v23, %v401_v28  ;;  %v372_v59 = vsel %vm371_vm14, %v369_v52, %v366_v60  ;;  %v387_v39 = vadd.f32 %v363_v6, %v131_v32 }
  0xa2   :  { %v434_v62 = vmul.f32 %v418_v54, %v402_v34  ;;  %v388_v13 = vadd.f32 %v372_v59, %v132_v49 }
  0xa3   :  { %v449_v12 = vadd.f32 %v433_v40, %v97_v58  ;;  %v403_v55 = vsel %vm147_vm15, %v1146_v50, %v387_v39  ;;  %v531_v50 = vld [vmem:[%s1266_s5] sm:$0x1] }
  0xa4   :  { %v450_v4 = vadd.f32 %v434_v62, %v98_v44  ;;  %v404_v19 = vsel %vm148_vm0, %v1148_v61, %v388_v13  ;;  %v435_v41 = vmul.f32 %v419_v5, %v403_v55  ;;  %v535_v53 = vand.u32 2147483647, %v531_v50 }
  0xa5   :  { %v436_v1 = vmul.f32 %v420_v8, %v404_v19  ;;  %v532_v30 = vmax.f32 %v531_v50, 0.0  ;;  %vm533_vm2 = vcmp.ne.f32.partialorder %v531_v50, %v531_v50 }
  0xa6   :  { %v650_v63 = vpack.c.bf16 %v450_v4, %v449_v12  ;;  %v451_v48 = vadd.f32 %v435_v41, %v99_v56  ;;  %v536_v42 = vsub.f32 0.0, %v535_v53 }
  0xa7   :  { %v452_v43 = vadd.f32 %v436_v1, %v100_v3 }
  0xa8   :  { %651 = vmatpush3.bf16.xpose.msra.mxu0 %v650_v63  ;;  %v537_v20 = vmul.f32 1.442695, %v536_v42 }
  0xa9   :  { %652 = vmatprep.subr.bf16.mxu0 %v857_v0  ;;  %v653_v7 = vpack.c.bf16 %v452_v43, %v451_v48 }
  0xaa   :  { %729 = vpow2.f32 %v537_v20 }
  0xb0   :  { %654 = vmatpush3.bf16.xpose.msra.mxu0 %v653_v7 }
  0xb4   :  { %v730_v61 = vpop.eup %729 }
  0xb5   :  { %v539_v25 = vadd.f32 1.0, %v730_v61  ;;  %v542_v14 = vmul.f32 -0.5, %v730_v61  ;;  %v545_v10 = vand.u32 2147483647, %v730_v61 }
  0xb7   :  { %629 = vmatmul.mubr.f32.vlgmr.msra.gmra.mrb[0].mxu0 %v454_v24  ;;  %731 = vlog2.f32 %v539_v25  ;;  %v543_v15 = vadd.f32 1.0, %v542_v14  ;;  %vm546_vm1 = vcmp.lt.f32.partialorder %v545_v10, 0.0004427343 }
  0xb9   :  { %v544_v17 = vmul.f32 %v730_v61, %v543_v15 }
  0xc1   :  { %v732_v16 = vpop.eup %731 }
  0xc2   :  { %v541_v0 = vmul.f32 0.6931472, %v732_v16 }
  0xc4   :  { %v547_v31 = vsel %vm546_vm1, %v544_v17, %v541_v0 }
  0xc5   :  { %v548_v29 = vadd.f32 %v547_v31, %v532_v30 }
  0xc7   :  { %v549_v9 = vsel %vm533_vm2, %v531_v50, %v548_v29 }
  0xc8   :  { %v551_v18 = vmul.f32 %v550_v11, %v549_v9 }
  0xca   :  { %v552_v47 = vadd.f32 %v551_v18, %v530_v45 }
  0xcc   :  { %v558_v37 = vrot.slane %v552_v47, %v557_v46 }
 0x18a   :  { %v521_v21 = vpop.f32.mrb[0].mxu0 }
 0x18b   :  { %v560_v32 = vadd.f32 %v558_v37, %v521_v21  ;;  %v630_v26 = vpop.f32.mrb[1].mxu0 }
 0x18d   :  { %561 = vst [vmem:[#allocation11] sm:$0xff] %v560_v32 }
 0x18e   :  { %832 = shalt.err (!%p829_p8)
}
 0x18f   :  { %s833_s4 = scalar_lea.hbm %s1268_s7, 128 }
 0x190   :  { %p834_p9 = scmp.ne.s32.totalorder %s1268_s7, %s833_s4  ;;  %p837_p10 = scmp.lt.u32.totalorder %s833_s4, %s1268_s7 }
 0x192   :  { %p839_p11 = pnand %p837_p10, %p834_p9 }
 0x194   :  { %842 = shalt.err (!%p839_p11)
}
 0x195   :  { %571 = dma.vmem_to_hbm [thread:$0]  %s569_s29, 128, %s1268_s7, [#allocation5]  }
 0x196   :  { %849 = dma.done.wait [#allocation5], 128  }
 0x197   :  { %850 = vsyncadd [#allocation5], 4294967168 }
 0x198   :  { %575 = vsyncpa [#allocation4], 1 }
 0x199   :  { %576 = vsyncpa [#allocation7], 1 }
 0x19a   :  { %577 = vsyncpa [#allocation10], 1 }
 0x19b   :  { %578 = vsyncpa [#allocation5], 1 }

</bundles_post_ra>
